<compile_context>
chip_gen: v5e
topology: v5e:2x2
jax: 0.10.0
libtpu: 0.0.40
codegen_flags: <defaults>
</compile_context>

<pallas_src>
import math

import jax
import jax.numpy as jnp
from jax.experimental import pallas as pl
from jax.experimental.pallas import tpu as pltpu  # noqa: F401  (TPU backend)

# ----------------------------- configuration -----------------------------
B = 2          # batch
S = 8          # sequence length
H = 32         # hidden size
NUM_HEADS = 4
HEAD_DIM = H // NUM_HEADS
SCALE = 1.0 / math.sqrt(HEAD_DIM)


# ------------------------------- kernel ----------------------------------
def attention_kernel(x_ref, wqkv_ref, bqkv_ref, wo_ref, bo_ref,
                     out_ref, probs_ref):
    # x_ref: (B*S, H) float32 — no redundant cast needed.
    x = x_ref[...]

    # Fused Q/K/V projection: single MXU push + single bias add.
    qkv = jnp.dot(x, wqkv_ref[...],
                  preferred_element_type=jnp.float32) + bqkv_ref[...]   # (B*S, 3H)
    qkv3 = qkv.reshape(B, S, 3 * H)                                     # leading split only

    # Build head-major batched tensors; leading index = h * B + b.
    # Only lane slices + leading-dim concat (no minor-dim relayout).
    def gather_heads(p):
        base = p * H
        return jnp.concatenate(
            [qkv3[:, :, base + h * HEAD_DIM: base + (h + 1) * HEAD_DIM]
             for h in range(NUM_HEADS)],
            axis=0)                                                     # (NH*B, S, HD)

    q_h = gather_heads(0)
    k_h = gather_heads(1)
    v_h = gather_heads(2)

    # Scaled dot-product attention, batched over (head, batch) in one einsum.
    scores = jnp.einsum('nqd,nkd->nqk', q_h, k_h,
                        preferred_element_type=jnp.float32) * SCALE     # (NH*B, S, S)
    scores = scores - jnp.max(scores, axis=-1, keepdims=True)
    e = jnp.exp(scores)
    denom = jnp.sum(e, axis=-1, keepdims=True)
    probs = e * pl.reciprocal(denom, approx=True)                       # EUP reciprocal

    # Single store of the attention weights (leading-dim split only).
    probs_ref[...] = probs.reshape(NUM_HEADS, B, S, S).astype(probs_ref.dtype)

    # attn_dropout is identity at inference.
    ctx = jnp.einsum('nqk,nkd->nqd', probs, v_h,
                     preferred_element_type=jnp.float32)                # (NH*B, S, HD)

    # Re-concatenate heads along the hidden axis (head-major columns match wo).
    context = jnp.concatenate(
        [ctx[h * B:(h + 1) * B] for h in range(NUM_HEADS)], axis=-1)    # (B, S, H)
    context = context.reshape(B * S, H)                                 # leading merge only

    # Output projection; proj_dropout is identity at inference.
    out = jnp.dot(context, wo_ref[...],
                  preferred_element_type=jnp.float32) + bo_ref[...]     # (B*S, H)
    out_ref[...] = out.astype(out_ref.dtype)


# ------------------------------- wrapper ----------------------------------
def attention_forward(x, wq, bq, wk, bk, wv, bv, wo, bo):
    """x: (B, S, H) -> (attention_output (B,S,H), weights (B, NUM_HEADS, S, S))."""
    Bv, Sv, Hv = x.shape

    # Free layout plumbing in the wrapper: flatten activations, fuse QKV params.
    x2 = x.reshape(Bv * Sv, Hv)
    wqkv = jnp.concatenate([wq, wk, wv], axis=1)    # (H, 3H)
    bqkv = jnp.concatenate([bq, bk, bv], axis=1)    # (1, 3H)

    out_flat, probs_hb = pl.pallas_call(
        attention_kernel,
        out_shape=(
            jax.ShapeDtypeStruct((Bv * Sv, Hv), x.dtype),
            jax.ShapeDtypeStruct((NUM_HEADS, Bv, Sv, Sv), jnp.float32),
        ),
    )(x2, wqkv, bqkv, wo, bo)

    out = out_flat.reshape(Bv, Sv, Hv)
    weights = jnp.transpose(probs_hb, (1, 0, 2, 3))  # (B, NH, S, S) — wrapper-side, free
    return out, weights


# ----------------------------- reference ----------------------------------
def attention_reference(x, wq, bq, wk, bk, wv, bv, wo, bo):
    q = x @ wq + bq
    k = x @ wk + bk
    v = x @ wv + bv

    def split_heads(t):  # (B,S,H) -> (B, nh, S, hd)
        return t.reshape(B, S, NUM_HEADS, HEAD_DIM).transpose(0, 2, 1, 3)

    qh, kh, vh = split_heads(q), split_heads(k), split_heads(v)
    scores = jnp.einsum('bhqd,bhkd->bhqk', qh, kh) * SCALE
    probs = jax.nn.softmax(scores, axis=-1)
    ctx = jnp.einsum('bhqk,bhkd->bhqd', probs, vh)
    ctx = ctx.transpose(0, 2, 1, 3).reshape(B, S, H)
    out = ctx @ wo + bo
    return out, probs


# --------------------------------- main ------------------------------------
if __name__ == "__main__":
    key = jax.random.PRNGKey(0)
    keys = jax.random.split(key, 9)

    x = jax.random.normal(keys[0], (B, S, H), dtype=jnp.float32)

    # Deterministic synthetic parameters (shapes per nn.Linear in __init__).
    wq = jax.random.normal(keys[1], (H, H), dtype=jnp.float32) * 0.02
    wk = jax.random.normal(keys[2], (H, H), dtype=jnp.float32) * 0.02
    wv = jax.random.normal(keys[3], (H, H), dtype=jnp.float32) * 0.02
    wo = jax.random.normal(keys[4], (H, H), dtype=jnp.float32) * 0.02
    bq = jax.random.normal(keys[5], (1, H), dtype=jnp.float32) * 0.01
    bk = jax.random.normal(keys[6], (1, H), dtype=jnp.float32) * 0.01
    bv = jax.random.normal(keys[7], (1, H), dtype=jnp.float32) * 0.01
    bo = jax.random.normal(keys[8], (1, H), dtype=jnp.float32) * 0.01

    out, weights = attention_forward(x, wq, bq, wk, bk, wv, bv, wo, bo)
    out = jax.block_until_ready(out)
    weights = jax.block_until_ready(weights)

    ref_out, ref_weights = attention_reference(x, wq, bq, wk, bk, wv, bv, wo, bo)
    # Tolerance accounts for the approximate EUP reciprocal in the softmax.
    assert jnp.allclose(out, ref_out, rtol=2e-3, atol=2e-3), "output mismatch"
    assert jnp.allclose(weights, ref_weights, rtol=2e-3, atol=2e-3), "weights mismatch"

    # TODO(synk): attn_dropout / proj_dropout are identity (inference mode);
    # training-mode stochastic dropout would need pltpu.prng_seed/prng_random_bits.
    print("KERNEL_OK")
</pallas_src>

<mosaic_0001>
module attributes {stable_mosaic.version = 11 : i64} {
  func.func @attention_kernel(%arg0: memref<16x32xf32, #tpu.memory_space<vmem>>, %arg1: memref<32x96xf32, #tpu.memory_space<vmem>>, %arg2: memref<1x96xf32, #tpu.memory_space<vmem>>, %arg3: memref<32x32xf32, #tpu.memory_space<vmem>>, %arg4: memref<1x32xf32, #tpu.memory_space<vmem>>, %arg5: memref<16x32xf32, #tpu.memory_space<vmem>>, %arg6: memref<4x2x8x8xf32, #tpu.memory_space<vmem>>) attributes {dimension_semantics = [], scalar_prefetch = 0 : i64, scratch_operands = 0 : i64, tpu.core_type = #tpu.core_type<tc>} {
    %c0 = arith.constant 0 : index
    %c0_0 = arith.constant 0 : index
    %0 = vector.load %arg0[%c0, %c0_0] : memref<16x32xf32, #tpu.memory_space<vmem>>, vector<16x32xf32>
    %c0_1 = arith.constant 0 : index
    %c0_2 = arith.constant 0 : index
    %1 = vector.load %arg1[%c0_1, %c0_2] : memref<32x96xf32, #tpu.memory_space<vmem>>, vector<32x96xf32>
    %cst = arith.constant dense<0.000000e+00> : vector<16x96xf32>
    %2 = tpu.matmul %0, %1, %cst {dimension_numbers = #tpu.dot_dimension_numbers<[1], [0], [0], [1], [0, 0, 1, 1], [], []>} : vector<16x32xf32>, vector<32x96xf32>, vector<16x96xf32> -> vector<16x96xf32>
    %c0_3 = arith.constant 0 : index
    %c0_4 = arith.constant 0 : index
    %3 = vector.load %arg2[%c0_3, %c0_4] : memref<1x96xf32, #tpu.memory_space<vmem>>, vector<1x96xf32>
    %4 = vector.broadcast %3 : vector<1x96xf32> to vector<16x96xf32>
    %5 = arith.addf %2, %4 : vector<16x96xf32>
    %6 = vector.shape_cast %5 : vector<16x96xf32> to vector<2x8x96xf32>
    %7 = vector.extract_strided_slice %6 {offsets = [0, 0, 0], sizes = [2, 8, 8], strides = [1, 1, 1]} : vector<2x8x96xf32> to vector<2x8x8xf32>
    %8 = vector.extract_strided_slice %6 {offsets = [0, 0, 8], sizes = [2, 8, 8], strides = [1, 1, 1]} : vector<2x8x96xf32> to vector<2x8x8xf32>
    %9 = vector.extract_strided_slice %6 {offsets = [0, 0, 16], sizes = [2, 8, 8], strides = [1, 1, 1]} : vector<2x8x96xf32> to vector<2x8x8xf32>
    %10 = vector.extract_strided_slice %6 {offsets = [0, 0, 24], sizes = [2, 8, 8], strides = [1, 1, 1]} : vector<2x8x96xf32> to vector<2x8x8xf32>
    %11 = tpu.concatenate %7, %8, %9, %10 in 0 : vector<2x8x8xf32>, vector<2x8x8xf32>, vector<2x8x8xf32>, vector<2x8x8xf32> -> vector<8x8x8xf32>
    %12 = vector.extract_strided_slice %6 {offsets = [0, 0, 32], sizes = [2, 8, 8], strides = [1, 1, 1]} : vector<2x8x96xf32> to vector<2x8x8xf32>
    %13 = vector.extract_strided_slice %6 {offsets = [0, 0, 40], sizes = [2, 8, 8], strides = [1, 1, 1]} : vector<2x8x96xf32> to vector<2x8x8xf32>
    %14 = vector.extract_strided_slice %6 {offsets = [0, 0, 48], sizes = [2, 8, 8], strides = [1, 1, 1]} : vector<2x8x96xf32> to vector<2x8x8xf32>
    %15 = vector.extract_strided_slice %6 {offsets = [0, 0, 56], sizes = [2, 8, 8], strides = [1, 1, 1]} : vector<2x8x96xf32> to vector<2x8x8xf32>
    %16 = tpu.concatenate %12, %13, %14, %15 in 0 : vector<2x8x8xf32>, vector<2x8x8xf32>, vector<2x8x8xf32>, vector<2x8x8xf32> -> vector<8x8x8xf32>
    %17 = vector.extract_strided_slice %6 {offsets = [0, 0, 64], sizes = [2, 8, 8], strides = [1, 1, 1]} : vector<2x8x96xf32> to vector<2x8x8xf32>
    %18 = vector.extract_strided_slice %6 {offsets = [0, 0, 72], sizes = [2, 8, 8], strides = [1, 1, 1]} : vector<2x8x96xf32> to vector<2x8x8xf32>
    %19 = vector.extract_strided_slice %6 {offsets = [0, 0, 80], sizes = [2, 8, 8], strides = [1, 1, 1]} : vector<2x8x96xf32> to vector<2x8x8xf32>
    %20 = vector.extract_strided_slice %6 {offsets = [0, 0, 88], sizes = [2, 8, 8], strides = [1, 1, 1]} : vector<2x8x96xf32> to vector<2x8x8xf32>
    %21 = tpu.concatenate %17, %18, %19, %20 in 0 : vector<2x8x8xf32>, vector<2x8x8xf32>, vector<2x8x8xf32>, vector<2x8x8xf32> -> vector<8x8x8xf32>
    "tpu.trace_start"() <{level = 10 : i32, message = "nqd,nkd->nqk"}> : () -> ()
    %cst_5 = arith.constant dense<0.000000e+00> : vector<8x8x8xf32>
    %22 = tpu.matmul %11, %16, %cst_5 {dimension_numbers = #tpu.dot_dimension_numbers<[2], [2], [1], [1], [0, 0, 0, 1, 1, 1], [0], [0]>} : vector<8x8x8xf32>, vector<8x8x8xf32>, vector<8x8x8xf32> -> vector<8x8x8xf32>
    "tpu.trace_stop"() : () -> ()
    %cst_6 = arith.constant 0.353553385 : f32
    %23 = vector.broadcast %cst_6 : f32 to vector<8x8x8xf32>
    %24 = arith.mulf %22, %23 : vector<8x8x8xf32>
    %cst_7 = arith.constant dense<0xFF800000> : vector<8x8xf32>
    %25 = vector.multi_reduction <maximumf>, %24, %cst_7 [2] : vector<8x8x8xf32> to vector<8x8xf32>
    %26 = vector.shape_cast %25 : vector<8x8xf32> to vector<8x8x1xf32>
    %27 = vector.broadcast %26 : vector<8x8x1xf32> to vector<8x8x8xf32>
    %28 = arith.subf %24, %27 : vector<8x8x8xf32>
    %29 = math.exp %28 : vector<8x8x8xf32>
    %cst_8 = arith.constant dense<0.000000e+00> : vector<8x8xf32>
    %30 = vector.multi_reduction <add>, %29, %cst_8 [2] : vector<8x8x8xf32> to vector<8x8xf32>
    %31 = vector.shape_cast %30 : vector<8x8xf32> to vector<8x8x1xf32>
    %32 = tpu.reciprocal %31 {approx = true} : vector<8x8x1xf32> -> vector<8x8x1xf32>
    %33 = vector.broadcast %32 : vector<8x8x1xf32> to vector<8x8x8xf32>
    %34 = arith.mulf %29, %33 : vector<8x8x8xf32>
    %35 = vector.shape_cast %34 : vector<8x8x8xf32> to vector<4x2x8x8xf32>
    %c0_9 = arith.constant 0 : index
    %c0_10 = arith.constant 0 : index
    %c0_11 = arith.constant 0 : index
    %c0_12 = arith.constant 0 : index
    %36 = vector.load %arg6[%c0_9, %c0_10, %c0_11, %c0_12] : memref<4x2x8x8xf32, #tpu.memory_space<vmem>>, vector<4x2x8x8xf32>
    tpu.vector_store %arg6[%c0_9, %c0_10, %c0_11, %c0_12], %35 {strides = array<i32>} : memref<4x2x8x8xf32, #tpu.memory_space<vmem>>, vector<4x2x8x8xf32>,
    "tpu.trace_start"() <{level = 10 : i32, message = "nqk,nkd->nqd"}> : () -> ()
    %cst_13 = arith.constant dense<0.000000e+00> : vector<8x8x8xf32>
    %37 = tpu.matmul %34, %21, %cst_13 {dimension_numbers = #tpu.dot_dimension_numbers<[2], [1], [1], [2], [0, 0, 0, 1, 1, 2], [0], [0]>} : vector<8x8x8xf32>, vector<8x8x8xf32>, vector<8x8x8xf32> -> vector<8x8x8xf32>
    "tpu.trace_stop"() : () -> ()
    %38 = vector.extract_strided_slice %37 {offsets = [0, 0, 0], sizes = [2, 8, 8], strides = [1, 1, 1]} : vector<8x8x8xf32> to vector<2x8x8xf32>
    %39 = vector.extract_strided_slice %37 {offsets = [2, 0, 0], sizes = [2, 8, 8], strides = [1, 1, 1]} : vector<8x8x8xf32> to vector<2x8x8xf32>
    %40 = vector.extract_strided_slice %37 {offsets = [4, 0, 0], sizes = [2, 8, 8], strides = [1, 1, 1]} : vector<8x8x8xf32> to vector<2x8x8xf32>
    %41 = vector.extract_strided_slice %37 {offsets = [6, 0, 0], sizes = [2, 8, 8], strides = [1, 1, 1]} : vector<8x8x8xf32> to vector<2x8x8xf32>
    %42 = tpu.concatenate %38, %39, %40, %41 in 2 : vector<2x8x8xf32>, vector<2x8x8xf32>, vector<2x8x8xf32>, vector<2x8x8xf32> -> vector<2x8x32xf32>
    %43 = vector.shape_cast %42 : vector<2x8x32xf32> to vector<16x32xf32>
    %c0_14 = arith.constant 0 : index
    %c0_15 = arith.constant 0 : index
    %44 = vector.load %arg3[%c0_14, %c0_15] : memref<32x32xf32, #tpu.memory_space<vmem>>, vector<32x32xf32>
    %cst_16 = arith.constant dense<0.000000e+00> : vector<16x32xf32>
    %45 = tpu.matmul %43, %44, %cst_16 {dimension_numbers = #tpu.dot_dimension_numbers<[1], [0], [0], [1], [0, 0, 1, 1], [], []>} : vector<16x32xf32>, vector<32x32xf32>, vector<16x32xf32> -> vector<16x32xf32>
    %c0_17 = arith.constant 0 : index
    %c0_18 = arith.constant 0 : index
    %46 = vector.load %arg4[%c0_17, %c0_18] : memref<1x32xf32, #tpu.memory_space<vmem>>, vector<1x32xf32>
    %47 = vector.broadcast %46 : vector<1x32xf32> to vector<16x32xf32>
    %48 = arith.addf %45, %47 : vector<16x32xf32>
    %c0_19 = arith.constant 0 : index
    %c0_20 = arith.constant 0 : index
    %49 = vector.load %arg5[%c0_19, %c0_20] : memref<16x32xf32, #tpu.memory_space<vmem>>, vector<16x32xf32>
    tpu.vector_store %arg5[%c0_19, %c0_20], %48 {strides = array<i32>} : memref<16x32xf32, #tpu.memory_space<vmem>>, vector<16x32xf32>,
    return
  }
}

</mosaic_0001>

<bundles_post_ra>
// kernel: tpu_custom_call.1
= control target key start
LH: loop header
LB: loop body
LE: loop exit
PB: predicated region body
PF: predicated region fallthrough
CT: control target
= control target key end

     0   :  { %12 = vsyncpa [#allocation3], 0  ;;  %s1172_s0 = inlined_call_operand.hbm [shape: f32[16,32], index: 0, kind: input, shape index: {}]   ;;  %s1173_s1 = inlined_call_operand.hbm [shape: f32[32,96], index: 1, kind: input, shape index: {}]   ;;  %s1174_s2 = inlined_call_operand.vmem [shape: f32[1,96], index: 2, kind: input, shape index: {}]   ;;  %s1175_s3 = inlined_call_operand.hbm [shape: f32[32,32], index: 3, kind: input, shape index: {}]   ;;  %s1176_s4 = inlined_call_operand.vmem [shape: f32[1,32], index: 4, kind: input, shape index: {}]   ;;  %s1177_s5 = inlined_call_operand.hbm [shape: f32[16,32], index: 5, kind: output, shape index: {0}]   ;;  %s1178_s6 = inlined_call_operand.hbm [shape: f32[4,2,8,8], index: 6, kind: output, shape index: {1}]  }
   0x1   :  { %13 = vsyncpa [#allocation6], 0 }
   0x2   :  { %14 = vsyncpa [#allocation4], 0 }
   0x3   :  { %15 = vsyncpa [#allocation10], 0  ;;  %s33_s23 = sshll.u32 %s1173_s1, 4  ;;  %s974_s24 = smov [#allocation5]   ;;  %s34_s23 = int_to_ptr.hbm [resolvable:$true] %s33_s23 }
   0x4   :  { %s35_s25 = sshll.u32 %s974_s24, 4  ;;  %s20_s28 = sshll.u32 %s1172_s0, 4  ;;  %s36_s25 = int_to_ptr.vmem [resolvable:$true] %s35_s25  ;;  %s21_s28 = int_to_ptr.hbm [resolvable:$true] %s20_s28 }
   0x5   :  { %s975_s29 = smov 128   ;;  %s976_s30 = smov 8  }
   0x6   :  { %41 = dma.hbm_to_vmem [thread:$0]  %s34_s23, 512, %s36_s25, [#allocation6], %s975_s29, %s975_s29, %s976_s30  }
   0x7   :  { %s977_s7 = smov [#allocation2]   ;;  %s48_s1 = sshll.u32 %s1175_s3, 4  ;;  %s49_s1 = int_to_ptr.hbm [resolvable:$true] %s48_s1 }
   0x8   :  { %s22_s8 = sshll.u32 %s977_s7, 4  ;;  %s978_s0 = smov [#allocation7]   ;;  %s23_s8 = int_to_ptr.vmem [resolvable:$true] %s22_s8 }
   0x9   :  { %28 = dma.hbm_to_vmem [thread:$0]  %s21_s28, 256, %s23_s8, [#allocation3], %s975_s29, %s975_s29, %s976_s30  }
   0xa   :  { %s50_s11 = sshll.u32 %s978_s0, 4  ;;  %s51_s11 = int_to_ptr.vmem [resolvable:$true] %s50_s11 }
   0xb   :  { %56 = dma.hbm_to_vmem [thread:$0]  %s49_s1, 512, %s51_s11, [#allocation6], %s975_s29, %s975_s29, %s976_s30  }
   0xc   :  { %966 = dma.done.wait [#allocation3], 256  }
   0xd   :  { %967 = vsyncadd [#allocation3], 4294967040 }
   0xe   :  { %968 = dma.done.wait [#allocation6], 1024  }
   0xf   :  { %969 = vsyncadd [#allocation6], 4294966272  ;;  %v76_v0 = vld [vmem:[#allocation5 + $0x18] sm:$0xff]  ;;  %v75_v1 = vld [vmem:[#allocation5 + $0x10] sm:$0xff]  ;;  %vm81_vm0 = vcmask 261120   ;;  %s979_s13 = smov 104  }
  0x10   :  { %100 = vmatpush.msra.mxu0 %v76_v0  ;;  %v74_v2 = vld [vmem:[#allocation5 + $0x8] sm:$0xff]  ;;  %v73_v3 = vld [vmem:[#allocation5] sm:$0xff]  ;;  %v71_v4 = vld [vmem:[#allocation2] sm:$0xff]  ;;  %s980_s14 = smov 112   ;;  %s981_s15 = smov 120   ;;  %vm127_vm1 = vcmask 64512  }
  0x11   :  { %v72_v5 = vld [vmem:[#allocation2 + $0x8] sm:$0xff]  ;;  %v812_v6 = vld [vmem:[%s1174_s2] ss:$0 sm:$0xff]  ;;  %s982_s2 = smov 96   ;;  %s983_s16 = smov 64   ;;  %vm672_vm2 = vcmask 130048  }
  0x12   :  { %101 = vmatpush.msra.mxu0 %v75_v1  ;;  %s984_s17 = smov 24   ;;  %s985_s18 = smov 16   ;;  %vm675_vm3 = vcmask 195584  }
  0x13   :  { %s986_s19 = smov [#allocation9]   ;;  %s736_s23 = sshll.u32 %s1178_s6, 4  ;;  %s737_s23 = int_to_ptr.hbm [resolvable:$true] %s736_s23 }
  0x14   :  { %102 = vmatpush.msra.mxu0 %v74_v2  ;;  %s734_s20 = sshll.u32 %s986_s19, 4  ;;  %s987_s26 = smov [#allocation8]   ;;  %s735_s20 = int_to_ptr.vmem [resolvable:$true] %s734_s20 }
  0x15   :  { %s721_s27 = sshll.u32 %s987_s26, 4  ;;  %s723_s6 = sshll.u32 %s1177_s5, 4  ;;  %s722_s27 = int_to_ptr.vmem [resolvable:$true] %s721_s27  ;;  %s724_s6 = int_to_ptr.hbm [resolvable:$true] %s723_s6 }
  0x16   :  { %103 = vmatpush.msra.mxu0 %v73_v3 }
  0x17   :  { %755 = vmatmul.msk.f32.vlgmr.msra.gmra.mxu0 %vm81_vm0, %v71_v4 }
  0x1f   :  { %756 = vmatmul.msk.f32.gmra.mxu0 %vm81_vm0, %v72_v5 }
  0x94   :  { %v105_v7 = vpop.f32.mrf.mxu0 }
  0x95   :  { %v1046_v8 = vadd.f32 %v812_v6, %v105_v7 }
  0x97   :  { %121 = vrot.lane.b32.xlu2 %v1046_v8, %s979_s13  ;;  %117 = vrot.lane.b32.xlu0 %v1046_v8, %s980_s14 }
  0x9c   :  { %v108_v9 = vpop.f32.mrf.mxu0 }
  0x9d   :  { %v1050_v10 = vadd.f32 %v812_v6, %v108_v9 }
  0x9f   :  { %115 = vrot.lane.b32.xlu1 %v1050_v10, %s981_s15  ;;  %119 = vrot.lane.b32.xlu2 %v1050_v10, %s980_s14 }
  0xa0   :  { %113 = vrot.lane.b32.xlu0 %v1046_v8, %s981_s15 }
  0xa7   :  { %123 = vrot.lane.b32.xlu1 %v1050_v10, %s979_s13 }
  0xa8   :  { %152 = vrot.lane.b32.xlu0 %v1050_v10, %s982_s2 }
  0xaf   :  { %125 = vrot.lane.b32.xlu1 %v1046_v8, %s982_s2 }
  0xf1   :  { %v1061_v12 = vpop.permute.xlu2 %121 }
  0xf9   :  { %v1069_v15 = vpop.permute.xlu2 %119 }
 0x109   :  { %v1058_v11 = vpop.permute.xlu0 %117 }
 0x10a   :  { %230 = vrot.lane.b32.xlu2 %v1058_v11, %s982_s2 }
 0x111   :  { %v1063_v13 = vpop.permute.xlu1 %115 }
 0x112   :  { %v1065_v14 = vpop.permute.xlu0 %113  ;;  %204 = vrot.lane.b32.xlu1 %v1063_v13, %s982_s2 }
 0x113   :  { %178 = vrot.lane.b32.xlu0 %v1065_v14, %s982_s2  ;;  %v797_v45 = vpack.i.bf16 %v1065_v14, %v1046_v8 }
 0x119   :  { %v1071_v16 = vpop.permute.xlu1 %123 }
 0x11a   :  { %v153_v17 = vpop.permute.xlu0 %152  ;;  %256 = vrot.lane.b32.xlu1 %v1069_v15, %s982_s2  ;;  %308 = vrot.lane.b32.xlu2 %v1071_v16, %s982_s2 }
 0x11b   :  { %282 = vrot.lane.b32.xlu0 %v1061_v12, %s982_s2  ;;  %759 = vmatpush.xpose.msk.msra.mxu2 %vm127_vm1, %v153_v17 }
 0x11e   :  { %760 = vmatmul.msk.f32.vlgmr.msra.gmra.mxu2 %vm127_vm1, %v1050_v10 }
 0x121   :  { %v126_v18 = vpop.permute.xlu1 %125 }
 0x122   :  { %757 = vmatpush.xpose.msk.msra.mxu1 %vm127_vm1, %v126_v18 }
 0x125   :  { %758 = vmatmul.msk.f32.vlgmr.msra.gmra.mxu1 %vm127_vm1, %v1046_v8 }
 0x164   :  { %v231_v19 = vpop.permute.xlu2 %230 }
 0x165   :  { %765 = vmatpush.xpose.msk.msrb.mxu2 %vm127_vm1, %v231_v19 }
 0x168   :  { %766 = vmatmul.msk.f32.vlgmr.msrb.gmra.mxu2 %vm127_vm1, %v1058_v11 }
 0x174   :  { %v309_v20 = vpop.permute.xlu2 %308 }
 0x175   :  { %771 = vmatpush.xpose.msk.msra.mxu2 %vm127_vm1, %v309_v20 }
 0x178   :  { %772 = vmatmul.msk.f32.vlgmr.msra.gmra.mxu2 %vm127_vm1, %v1071_v16 }
 0x184   :  { %v205_v21 = vpop.permute.xlu1 %204 }
 0x185   :  { %v179_v22 = vpop.permute.xlu0 %178  ;;  %763 = vmatpush.xpose.msk.msrb.mxu1 %vm127_vm1, %v205_v21 }
 0x186   :  { %761 = vmatpush.xpose.msk.msrb.mxu0 %vm127_vm1, %v179_v22 }
 0x188   :  { %764 = vmatmul.msk.f32.vlgmr.msrb.gmra.mxu1 %vm127_vm1, %v1063_v13 }
 0x189   :  { %762 = vmatmul.msk.f32.vlgmr.msrb.gmra.mxu0 %vm127_vm1, %v1065_v14 }
 0x18c   :  { %v257_v23 = vpop.permute.xlu1 %256 }
 0x18d   :  { %v283_v24 = vpop.permute.xlu0 %282  ;;  %767 = vmatpush.xpose.msk.msra.mxu3 %vm127_vm1, %v257_v23 }
 0x18e   :  { %769 = vmatpush.xpose.msk.msra.mxu1 %vm127_vm1, %v283_v24 }
 0x190   :  { %768 = vmatmul.msk.f32.vlgmr.msra.gmra.mxu3 %vm127_vm1, %v1069_v15 }
 0x191   :  { %770 = vmatmul.msk.f32.vlgmr.msra.gmra.mxu1 %vm127_vm1, %v1061_v12 }
 0x1a1   :  { %v175_v28 = vpop.f32.mrf.mxu2 }
 0x1a2   :  { %v149_v25 = vpop.f32.mrf.mxu1  ;;  %v335_v29 = vmul.f32 0.35355338, %v175_v28 }
 0x1a3   :  { %v334_v26 = vmul.f32 0.35355338, %v149_v25 }
 0x1a4   :  { %v345_v30 = vsel %vm127_vm1, %v335_v29, -inf }
 0x1a5   :  { %v342_v27 = vsel %vm127_vm1, %v334_v26, -inf }
 0x1a6   :  { %343 = vmax.xlane.f32.xlu2 %v342_v27 }
 0x1ae   :  { %346 = vmax.xlane.f32.xlu2 %v345_v30 }
 0x1eb   :  { %v253_v31 = vpop.f32.mrf.mxu2 }
 0x1ec   :  { %v338_v32 = vmul.f32 0.35355338, %v253_v31 }
 0x1ee   :  { %v354_v33 = vsel %vm127_vm1, %v338_v32, -inf }
 0x1ef   :  { %355 = vmax.xlane.f32.xlu1 %v354_v33 }
 0x1fb   :  { %v331_v34 = vpop.f32.mrf.mxu2 }
 0x1fc   :  { %v341_v35 = vmul.f32 0.35355338, %v331_v34 }
 0x1fe   :  { %v363_v36 = vsel %vm127_vm1, %v341_v35, -inf }
 0x1ff   :  { %364 = vmax.xlane.f32.xlu1 %v363_v36 }
 0x205   :  { %v227_v37 = vpop.f32.mrf.mxu1 }
 0x206   :  { %v201_v38 = vpop.f32.mrf.mxu0  ;;  %v337_v39 = vmul.f32 0.35355338, %v227_v37 }
 0x207   :  { %v336_v40 = vmul.f32 0.35355338, %v201_v38 }
 0x208   :  { %v351_v41 = vsel %vm127_vm1, %v337_v39, -inf }
 0x209   :  { %352 = vmax.xlane.f32.xlu2 %v351_v41  ;;  %v348_v42 = vsel %vm127_vm1, %v336_v40, -inf }
 0x20a   :  { %349 = vmax.xlane.f32.xlu0 %v348_v42 }
 0x20e   :  { %v305_v55 = vpop.f32.mrf.mxu1 }
 0x20f   :  { %v340_v56 = vmul.f32 0.35355338, %v305_v55 }
 0x211   :  { %v360_v59 = vsel %vm127_vm1, %v340_v56, -inf }
 0x213   :  { %v279_v43 = vpop.f32.mrf.mxu3 }
 0x214   :  { %v339_v44 = vmul.f32 0.35355338, %v279_v43 }
 0x216   :  { %v357_v46 = vsel %vm127_vm1, %v339_v44, -inf }
 0x217   :  { %358 = vmax.xlane.f32.xlu2 %v357_v46 }
 0x218   :  { %798 = vrot.lane.b32.xlu1 %v797_v45, %s983_s16 }
 0x219   :  { %v344_v47 = vpop.xlane.xlu2 %343 }
 0x21a   :  { %v366_v48 = vsub.f32 %v334_v26, %v344_v47 }
 0x21c   :  { %v374_v49 = vmul.f32 1.442695, %v366_v48 }
 0x21e   :  { %814 = vpow2.f32 %v374_v49 }
 0x221   :  { %v347_v50 = vpop.xlane.xlu2 %346 }
 0x222   :  { %v367_v51 = vsub.f32 %v335_v29, %v347_v50 }
 0x224   :  { %v815_v52 = vpop.eup %814  ;;  %v376_v53 = vmul.f32 1.442695, %v367_v51 }
 0x225   :  { %v390_v54 = vsel %vm127_vm1, %v815_v52, 0.0 }
 0x226   :  { %816 = vpow2.f32 %v376_v53  ;;  %391 = vadd.xlane.f32.xlu0 %v390_v54 }
 0x22c   :  { %v817_v57 = vpop.eup %816 }
 0x22d   :  { %v393_v58 = vsel %vm127_vm1, %v817_v57, 0.0 }
 0x22e   :  { %394 = vadd.xlane.f32.xlu2 %v393_v58  ;;  %361 = vmax.xlane.f32.xlu0 %v360_v59 }
 0x262   :  { %v356_v60 = vpop.xlane.xlu1 %355 }
 0x263   :  { %v370_v61 = vsub.f32 %v338_v32, %v356_v60  ;;  %v807_v32 = vpack.i.bf16 %v1061_v12, %v1050_v10 }
 0x265   :  { %v382_v62 = vmul.f32 1.442695, %v370_v61 }
 0x267   :  { %818 = vpow2.f32 %v382_v62 }
 0x26d   :  { %v1113_v63 = vpop.eup %818 }
 0x26e   :  { %v402_v0 = vsel %vm127_vm1, %v1113_v63, 0.0 }
 0x26f   :  { %403 = vadd.xlane.f32.xlu2 %v402_v0 }
 0x272   :  { %v365_v1 = vpop.xlane.xlu1 %364 }
 0x273   :  { %v373_v2 = vsub.f32 %v341_v35, %v365_v1 }
 0x275   :  { %v388_v3 = vmul.f32 1.442695, %v373_v2 }
 0x277   :  { %820 = vpow2.f32 %v388_v3 }
 0x27c   :  { %v353_v4 = vpop.xlane.xlu2 %352 }
 0x27d   :  { %v821_v5 = vpop.eup %820  ;;  %v369_v6 = vsub.f32 %v337_v39, %v353_v4  ;;  %v350_v7 = vpop.xlane.xlu0 %349 }
 0x27e   :  { %v368_v8 = vsub.f32 %v336_v40, %v350_v7  ;;  %v411_v9 = vsel %vm127_vm1, %v821_v5, 0.0  ;;  %v802_v40 = vpack.i.bf16 %v1063_v13, %v1058_v11  ;;  %v681_v7 = vld [vmem:[#allocation7 + $0x18] sm:$0xff] }
 0x27f   :  { %v380_v14 = vmul.f32 1.442695, %v369_v6  ;;  %412 = vadd.xlane.f32.xlu2 %v411_v9  ;;  %v679_v9 = vld [vmem:[#allocation7 + $0x8] sm:$0xff] }
 0x280   :  { %v378_v17 = vmul.f32 1.442695, %v368_v8  ;;  %v680_v8 = vld [vmem:[#allocation7 + $0x10] sm:$0xff] }
 0x281   :  { %822 = vpow2.f32 %v380_v14  ;;  %v678_v14 = vld [vmem:[#allocation7] sm:$0xff] }
 0x282   :  { %824 = vpow2.f32 %v378_v17 }
 0x287   :  { %v823_v18 = vpop.eup %822 }
 0x288   :  { %v825_v19 = vpop.eup %824  ;;  %v399_v20 = vsel %vm127_vm1, %v823_v18, 0.0 }
 0x289   :  { %400 = vadd.xlane.f32.xlu0 %v399_v20  ;;  %v396_v21 = vsel %vm127_vm1, %v825_v19, 0.0 }
 0x28a   :  { %397 = vadd.xlane.f32.xlu1 %v396_v21  ;;  %v359_v22 = vpop.xlane.xlu2 %358  ;;  %v799_v23 = vpop.permute.xlu1 %798 }
 0x28b   :  { %v371_v24 = vsub.f32 %v339_v44, %v359_v22  ;;  %v801_v25 = vunpack.i.h.bf16 %v799_v23  ;;  %v800_v26 = vunpack.i.l.bf16 %v799_v23 }
 0x28d   :  { %v384_v27 = vmul.f32 1.442695, %v371_v24  ;;  %459 = vmatpush.msrb.mxu3 %v800_v26  ;;  %511 = vmatpush.msrb.mxu1 %v801_v25 }
 0x28f   :  { %826 = vpow2.f32 %v384_v27 }
 0x295   :  { %v827_v28 = vpop.eup %826 }
 0x296   :  { %v405_v29 = vsel %vm127_vm1, %v827_v28, 0.0 }
 0x297   :  { %406 = vadd.xlane.f32.xlu2 %v405_v29  ;;  %v813_v29 = vld [vmem:[%s1176_s4] ss:$0 sm:$0xff] }
 0x299   :  { %v392_v30 = vpop.xlane.xlu0 %391 }
 0x29a   :  { %828 = vrcp.f32 %v392_v30 }
 0x2a0   :  { %v829_v31 = vpop.eup %828 }
 0x2a1   :  { %v395_v33 = vpop.xlane.xlu2 %394  ;;  %v362_v34 = vpop.xlane.xlu0 %361  ;;  %v422_v35 = vmul.f32 %v829_v31, %v815_v52 }
 0x2a2   :  { %830 = vrcp.f32 %v395_v33  ;;  %v372_v36 = vsub.f32 %v340_v56, %v362_v34 }
 0x2a3   :  { %808 = vrot.lane.b32.xlu1 %v807_v32, %s983_s16  ;;  %430 = vst.msk [vmem:[#allocation9] sm:$0xff] %vm127_vm1, %v422_v35  ;;  %773 = vmatmul.msk.f32.vlgmr.msrb.gmra.mxu3 %vm127_vm1, %v422_v35 }
 0x2a4   :  { %v386_v37 = vmul.f32 1.442695, %v372_v36 }
 0x2a6   :  { %832 = vpow2.f32 %v386_v37 }
 0x2a8   :  { %v831_v38 = vpop.eup %830 }
 0x2a9   :  { %v423_v39 = vmul.f32 %v831_v38, %v817_v57 }
 0x2ab   :  { %431 = vst.msk [vmem:[#allocation9 + $0x8] sm:$0xff] %vm127_vm1, %v423_v39  ;;  %568 = vrot.lane.b32.xlu1 %v1069_v15, %s983_s16 }
 0x2ac   :  { %v833_v10 = vpop.eup %832 }
 0x2ad   :  { %v408_v12 = vsel %vm127_vm1, %v833_v10, 0.0 }
 0x2ae   :  { %409 = vadd.xlane.f32.xlu0 %v408_v12 }
 0x2af   :  { %620 = vrot.lane.b32.xlu2 %v1071_v16, %s983_s16 }
 0x2c2   :  { %803 = vrot.lane.b32.xlu0 %v802_v40, %s983_s16 }
 0x2e2   :  { %v404_v41 = vpop.xlane.xlu2 %403 }
 0x2e3   :  { %834 = vrcp.f32 %v404_v41 }
 0x2e9   :  { %v835_v42 = vpop.eup %834 }
 0x2ea   :  { %v426_v43 = vmul.f32 %v835_v42, %v1113_v63 }
 0x2ec   :  { %434 = vst.msk [vmem:[#allocation9 + $0x20] sm:$0xff] %vm127_vm1, %v426_v43 }
 0x2f2   :  { %v413_v15 = vpop.xlane.xlu2 %412 }
 0x2f3   :  { %836 = vrcp.f32 %v413_v15 }
 0x2f9   :  { %v837_v44 = vpop.eup %836 }
 0x2fa   :  { %v429_v45 = vmul.f32 %v837_v44, %v821_v5 }
 0x2fc   :  { %437 = vst.msk [vmem:[#allocation9 + $0x38] sm:$0xff] %vm127_vm1, %v429_v45  ;;  %v401_v46 = vpop.xlane.xlu0 %400 }
 0x2fd   :  { %v398_v16 = vpop.xlane.xlu1 %397  ;;  %838 = vrcp.f32 %v401_v46 }
 0x2fe   :  { %840 = vrcp.f32 %v398_v16 }
 0x303   :  { %v839_v11 = vpop.eup %838 }
 0x304   :  { %v841_v13 = vpop.eup %840  ;;  %v425_v47 = vmul.f32 %v839_v11, %v823_v18 }
 0x305   :  { %v424_v48 = vmul.f32 %v841_v13, %v825_v19 }
 0x306   :  { %433 = vst.msk [vmem:[#allocation9 + $0x18] sm:$0xff] %vm127_vm1, %v425_v47 }
 0x307   :  { %432 = vst.msk [vmem:[#allocation9 + $0x10] sm:$0xff] %vm127_vm1, %v424_v48  ;;  %775 = vmatmul.msk.f32.vlgmr.msrb.gmra.mxu1 %vm127_vm1, %v424_v48 }
 0x30a   :  { %v407_v49 = vpop.xlane.xlu2 %406 }
 0x30b   :  { %842 = vrcp.f32 %v407_v49 }
 0x311   :  { %v843_v50 = vpop.eup %842 }
 0x312   :  { %v427_v51 = vmul.f32 %v843_v50, %v827_v28  ;;  %v621_v62 = vpop.permute.xlu2 %620 }
 0x314   :  { %435 = vst.msk [vmem:[#allocation9 + $0x28] sm:$0xff] %vm127_vm1, %v427_v51 }
 0x315   :  { %v809_v52 = vpop.permute.xlu1 %808 }
 0x316   :  { %v811_v53 = vunpack.i.h.bf16 %v809_v52  ;;  %v810_v54 = vunpack.i.l.bf16 %v809_v52 }
 0x318   :  { %485 = vmatpush.msra.mxu0 %v810_v54  ;;  %615 = vmatpush.msra.mxu1 %v811_v53 }
 0x319   :  { %774 = vmatmul.msk.f32.vlgmr.msra.gmra.mxu0 %vm127_vm1, %v423_v39 }
 0x31d   :  { %v569_v55 = vpop.permute.xlu1 %568 }
 0x31e   :  { %589 = vmatpush.msrb.mxu0 %v569_v55 }
 0x321   :  { %778 = vmatmul.msk.f32.vlgmr.msrb.gmra.mxu0 %vm127_vm1, %v427_v51  ;;  %v410_v56 = vpop.xlane.xlu0 %409 }
 0x322   :  { %844 = vrcp.f32 %v410_v56 }
 0x326   :  { %v461_v3 = vpop.f32.mrf.mxu3 }
 0x328   :  { %v845_v57 = vpop.eup %844 }
 0x329   :  { %v428_v58 = vmul.f32 %v845_v57, %v833_v10 }
 0x32b   :  { %436 = vst.msk [vmem:[#allocation9 + $0x30] sm:$0xff] %vm127_vm1, %v428_v58  ;;  %779 = vmatmul.msk.f32.vlgmr.msra.gmra.mxu1 %vm127_vm1, %v428_v58 }
 0x32c   :  { %742 = dma.vmem_to_hbm [thread:$0]  %s735_s20, 1024, %s737_s23, [#allocation10], %s975_s29, %s975_s29, %s976_s30  }
 0x334   :  { %v804_v59 = vpop.permute.xlu0 %803 }
 0x335   :  { %v806_v60 = vunpack.i.h.bf16 %v804_v59  ;;  %v805_v61 = vunpack.i.l.bf16 %v804_v59 }
 0x337   :  { %537 = vmatpush.msrb.mxu2 %v806_v60  ;;  %563 = vmatpush.msra.mxu3 %v805_v61 }
 0x338   :  { %776 = vmatmul.msk.f32.vlgmr.msrb.gmra.mxu2 %vm127_vm1, %v425_v47  ;;  %777 = vmatmul.msk.f32.vlgmr.msra.gmra.mxu3 %vm127_vm1, %v426_v43 }
 0x339   :  { %641 = vmatpush.msra.mxu2 %v621_v62  ;;  %704 = vmatpush.msrb.mxu3 %v681_v7 }
 0x33b   :  { %705 = vmatpush.msrb.mxu3 %v680_v8 }
 0x33d   :  { %706 = vmatpush.msrb.mxu3 %v679_v9 }
 0x33f   :  { %707 = vmatpush.msrb.mxu3 %v678_v14 }
 0x340   :  { %780 = vmatmul.msk.f32.vlgmr.msra.gmra.mxu2 %vm127_vm1, %v429_v45 }
 0x384   :  { %v513_v63 = vpop.f32.mrf.mxu1 }
 0x385   :  { %648 = vrot.lane.b32.xlu0 %v513_v63, %s976_s30 }
 0x396   :  { %v487_v0 = vpop.f32.mrf.mxu0 }
 0x39e   :  { %v591_v2 = vpop.f32.mrf.mxu0 }
 0x3a8   :  { %v617_v1 = vpop.f32.mrf.mxu1 }
 0x3a9   :  { %664 = vrot.lane.b32.xlu0 %v617_v1, %s984_s17 }
 0x3b1   :  { %658 = vrot.lane.b32.xlu0 %v591_v2, %s985_s18 }
 0x3bb   :  { %v539_v4 = vpop.f32.mrf.mxu2  ;;  %v565_v5 = vpop.f32.mrf.mxu3 }
 0x3bc   :  { %656 = vrot.lane.b32.xlu1 %v565_v5, %s985_s18 }
 0x3c3   :  { %v643_v6 = vpop.f32.mrf.mxu2 }
 0x3c4   :  { %666 = vrot.lane.b32.xlu2 %v643_v6, %s984_s17  ;;  %650 = vrot.lane.b32.xlu1 %v539_v4, %s976_s30 }
 0x3f7   :  { %v649_v17 = vpop.permute.xlu0 %648 }
 0x3f8   :  { %v670_v19 = vsel %vm127_vm1, %v461_v3, %v649_v17 }
 0x41b   :  { %v665_v18 = vpop.permute.xlu0 %664 }
 0x41e   :  { %v667_v26 = vpop.permute.xlu2 %666 }
 0x423   :  { %v659_v24 = vpop.permute.xlu0 %658 }
 0x42e   :  { %v657_v20 = vpop.permute.xlu1 %656 }
 0x42f   :  { %v673_v21 = vsel %vm672_vm2, %v670_v19, %v657_v20 }
 0x430   :  { %v676_v22 = vsel %vm675_vm3, %v673_v21, %v665_v18 }
 0x431   :  { %781 = vmatmul.msk.f32.vlgmr.msrb.gmra.mxu3 %vm81_vm0, %v676_v22 }
 0x436   :  { %v651_v23 = vpop.permute.xlu1 %650 }
 0x437   :  { %v671_v25 = vsel %vm127_vm1, %v487_v0, %v651_v23 }
 0x438   :  { %v674_v27 = vsel %vm672_vm2, %v671_v25, %v659_v24 }
 0x439   :  { %v677_v28 = vsel %vm675_vm3, %v674_v27, %v667_v26 }
 0x43a   :  { %782 = vmatmul.msk.f32.gmra.mxu3 %vm81_vm0, %v677_v28 }
 0x4b4   :  { %v709_v30 = vpop.f32.mrf.mxu3 }
 0x4b5   :  { %v710_v31 = vadd.f32 %v813_v29, %v709_v30 }
 0x4b7   :  { %715 = vst.msk [vmem:[#allocation8] sm:$0xff] %vm81_vm0, %v710_v31 }
 0x4bd   :  { %v712_v32 = vpop.f32.mrf.mxu3 }
 0x4be   :  { %v713_v33 = vadd.f32 %v813_v29, %v712_v32 }
 0x4c0   :  { %716 = vst.msk [vmem:[#allocation8 + $0x8] sm:$0xff] %vm81_vm0, %v713_v33 }
 0x4c1   :  { %729 = dma.vmem_to_hbm [thread:$0]  %s722_s27, 256, %s724_s6, [#allocation4], %s975_s29, %s975_s29, %s976_s30  }
 0x4c2   :  { %970 = dma.done.wait [#allocation4], 256  }
 0x4c3   :  { %971 = vsyncadd [#allocation4], 4294967040 }
 0x4c4   :  { %972 = dma.done.wait [#allocation10], 1024  }
 0x4c5   :  { %973 = vsyncadd [#allocation10], 4294966272 }
 0x4c6   :  { %751 = vsyncpa [#allocation3], 1 }
 0x4c7   :  { %752 = vsyncpa [#allocation6], 1 }
 0x4c8   :  { %753 = vsyncpa [#allocation4], 1 }
 0x4c9   :  { %754 = vsyncpa [#allocation10], 1 }

</bundles_post_ra>
